<compile_context>
chip_gen: v7x
topology: tpu7x:2x2x1
jax: 0.10.0
libtpu: 0.0.40
codegen_flags: <defaults>
</compile_context>

<pallas_src>
import numpy as np
import jax
import jax.numpy as jnp
from jax.experimental import pallas as pl
from jax.experimental.pallas import tpu as pltpu


def _round_up(x, m):
    return ((x + m - 1) // m) * m


def _make_rvq_kernel(num_q, tile_t, t_valid, compute_dtype):
    """Kernel closed over static Q, tile width, valid token count and dtype."""

    def kernel(x_ref, e_kd_ref, e_dk_ref, half_ref, out_ref, loss_ref):
        # x_ref:    (C, tile_t)      input tile, channels-first (lane-dense in T)
        # e_kd_ref: (Q, Kp, C)       resident codebooks (gather matmul operand)
        # e_dk_ref: (Q, C, Kp)       resident pre-transposed codebooks (score matmul)
        # half_ref: (Q, 1, Kp)       resident 0.5*||E||^2 (f32, padded rows = 1e30)
        # out_ref:  (C, tile_t)      quantized output tile
        # loss_ref: (1, 128)         per-tile sum-of-squared-residual partial
        t_idx = pl.program_id(1)            # top level only (never inside cond/when)

        # On-chip transpose to token-major (tile_t, C); avoids any wrapper HBM
        # transpose pass over the activations.
        x_t = x_ref[...].astype(jnp.float32).T          # (tile_t, C)

        res = x_t
        # Q is small and static -> fully unrolled in-kernel loop over the
        # VMEM-resident codebooks (no per-quantizer grid steps / re-DMA).
        for q in range(num_q):
            e_dk = e_dk_ref[q]                          # (C, Kp)  compute_dtype
            e_kd = e_kd_ref[q]                          # (Kp, C)  compute_dtype
            half = half_ref[q]                          # (1, Kp)  f32

            # score = r.e - 0.5*||e||^2  -> argmax == nearest code (the per-row
            # ||r||^2 term is constant and dropped).
            xe = jnp.dot(res.astype(compute_dtype), e_dk,
                         preferred_element_type=jnp.float32)     # (tile_t, Kp) MXU
            score = xe - half

            ind = jnp.argmax(score, axis=-1, keepdims=True)      # (tile_t, 1)
            onehot = (jax.lax.broadcasted_iota(jnp.int32, score.shape, 1)
                      == ind).astype(compute_dtype)              # exact 0/1
            quant = jnp.dot(onehot, e_kd,
                            preferred_element_type=jnp.float32)  # (tile_t, C) gather
            res = res - quant

        # quantized output == x - final residual (no per-step accumulator).
        out_ref[...] = (x_t - res).T.astype(out_ref.dtype)

        # Per-tile partial sum of squared residual; mask padded token positions.
        rows = t_idx * tile_t + jax.lax.broadcasted_iota(
            jnp.int32, (tile_t, 1), 0)
        valid = (rows < t_valid).astype(jnp.float32)             # (tile_t, 1)
        sse = jnp.sum(res * res * valid)
        loss_ref[...] = jnp.full(loss_ref.shape, sse, loss_ref.dtype)

    return kernel


def residual_vq_forward(x_bct, embeds, *, compute_dtype=jnp.bfloat16,
                        max_tile_t=1024):
    """ResidualVQ eval forward.

    x_bct:  (B, C, T) float32, channels-first (PyTorch layout, channel_last=False).
    embeds: (Q, K, C) float32 stacked per-quantizer codebooks.
    compute_dtype: dtype for the two MXU matmuls (f32 accumulate). bf16 is the
      production default (2x MXU rate, half the resident-codebook VMEM); pass
      jnp.float32 for bit parity with the f32 PyTorch path (near-tie argmax
      results may differ in bf16).
    Returns (quantized_out (B, C, T), num_replaces (Q,), loss scalar).
    """
    B, C, T = x_bct.shape
    Q, K, D = embeds.shape
    assert D == C

    # Token (T) tiling: lane-dense blocks along T; the block is either the full
    # T (small T) or a multiple-of-128 tile.  Grid = (B, T_tiles), both axes
    # "parallel" so v7x's two TensorCores split the work.
    if T <= max_tile_t:
        tile_t, t_pad = T, T
    else:
        tile_t = max_tile_t                       # multiple of 128
        t_pad = _round_up(T, tile_t)
    num_t_tiles = t_pad // tile_t

    x = x_bct.astype(jnp.float32)
    if t_pad > T:
        x = jnp.pad(x, ((0, 0), (0, 0), (0, t_pad - T)))

    # Codebooks: pad K to a lane-dense multiple of 128; precompute 0.5*||E||^2
    # once (f32); pre-transpose once to (Q, D, Kp) for the score matmul so the
    # kernel never transposes the codebook per step.  Both copies are cast to
    # compute_dtype and stay VMEM-resident across the whole grid.
    embeds_f32 = embeds.astype(jnp.float32)
    half_e2 = 0.5 * jnp.sum(embeds_f32 * embeds_f32, axis=-1)        # (Q, K)
    k_pad = _round_up(K, 128)
    if k_pad > K:
        embeds_f32 = jnp.pad(embeds_f32, ((0, 0), (0, k_pad - K), (0, 0)))
        # huge half-norm => score = -1e30 => padded codes are never selected
        half_e2 = jnp.pad(half_e2, ((0, 0), (0, k_pad - K)),
                          constant_values=np.float32(1e30))
    half_e2 = half_e2.reshape(Q, 1, k_pad)
    embed_kd = embeds_f32.astype(compute_dtype)                       # (Q, Kp, D)
    embed_dk = jnp.transpose(embeds_f32, (0, 2, 1)).astype(compute_dtype)  # (Q, D, Kp)

    # TODO(synk): for very large Q*Kp*D (resident codebooks) or tile_t*Kp
    # (score/one-hot intermediates), chunk K with a running (max, argmax) carry
    # and/or lower tile_t to respect v7x's 64 MiB VMEM.
    kernel = _make_rvq_kernel(Q, tile_t, T, compute_dtype)

    out, loss_part = pl.pallas_call(
        kernel,
        out_shape=(
            jax.ShapeDtypeStruct((B, C, t_pad), jnp.float32),
            jax.ShapeDtypeStruct((B, num_t_tiles, 1, 128), jnp.float32),
        ),
        grid=(B, num_t_tiles),
        in_specs=[
            pl.BlockSpec((None, C, tile_t), lambda b, t: (b, 0, t)),   # x tile
            pl.BlockSpec((Q, k_pad, D), lambda b, t: (0, 0, 0)),       # codebooks (resident)
            pl.BlockSpec((Q, D, k_pad), lambda b, t: (0, 0, 0)),       # codebooks^T (resident)
            pl.BlockSpec((Q, 1, k_pad), lambda b, t: (0, 0, 0)),       # 0.5*||E||^2 (resident)
        ],
        out_specs=[
            pl.BlockSpec((None, C, tile_t), lambda b, t: (b, 0, t)),   # quantized out
            pl.BlockSpec((None, None, 1, 128), lambda b, t: (b, t, 0, 0)),  # loss partials
        ],
        compiler_params=pltpu.CompilerParams(
            dimension_semantics=("parallel", "parallel"),
            vmem_limit_bytes=48 * 1024 * 1024,   # > 32 MiB scoped default, safe on v7x
        ),
    )(x, embed_kd, embed_dk, half_e2)

    quantized_out = out[:, :, :T]
    loss = jnp.sum(loss_part[:, :, 0, 0]) / jnp.float32(B * T * C)
    num_replaces = np.zeros(Q, dtype=np.int64)     # eval: no code expiry
    return quantized_out, num_replaces, loss


def _reference_forward(x_bct, embeds):
    """Pure-JAX reference mirroring the PyTorch eval path (original formula)."""
    B, C, T = x_bct.shape
    flat = jnp.transpose(x_bct, (0, 2, 1)).reshape(-1, C).astype(jnp.float32)
    res = flat
    out = jnp.zeros_like(flat)
    for q in range(embeds.shape[0]):
        e = embeds[q].astype(jnp.float32)
        dist = -(jnp.sum(res * res, 1, keepdims=True)
                 - 2.0 * res @ e.T
                 + jnp.sum(e * e, 1)[None, :])
        ind = jnp.argmax(dist, axis=-1)
        quant = e[ind]
        res = res - quant
        out = out + quant
    loss = jnp.mean((flat - out) ** 2)
    qout = out.reshape(B, T, C).transpose(0, 2, 1)
    return qout, loss


if __name__ == "__main__":
    # Small, deterministic configuration consistent with the module:
    #   dim (channels) = 32, codebook_size = 64, num_quantizers = 4
    B, C, T = 2, 32, 16
    num_quantizers = 4
    codebook_size = 64

    key = jax.random.PRNGKey(0)
    kx, ke = jax.random.split(key)
    x = jax.random.normal(kx, (B, C, T), dtype=jnp.float32)
    # embed = torch.randn(codebook_size, dim) per quantizer (deterministic here)
    embeds = jax.random.normal(
        ke, (num_quantizers, codebook_size, C), dtype=jnp.float32)

    # 1) f32 compute path: bit-parity check against the PyTorch-equivalent reference.
    q32, num_replaces, loss32 = residual_vq_forward(
        x, embeds, compute_dtype=jnp.float32)
    jax.block_until_ready((q32, loss32))

    ref_q, ref_loss = _reference_forward(x, embeds)
    np.testing.assert_allclose(np.asarray(q32), np.asarray(ref_q),
                               rtol=1e-5, atol=1e-5)
    np.testing.assert_allclose(float(loss32), float(ref_loss),
                               rtol=1e-5, atol=1e-6)
    assert num_replaces.shape == (num_quantizers,) and not num_replaces.any()

    # 2) production bf16-matmul path (argmax may differ on near-ties vs f32, so
    #    only sanity-checked, not bit-compared).
    qbf, _, lossbf = residual_vq_forward(x, embeds)          # default bf16
    jax.block_until_ready((qbf, lossbf))
    assert qbf.shape == x.shape
    assert bool(jnp.all(jnp.isfinite(qbf))) and bool(jnp.isfinite(lossbf))

    # TODO(synk): training-mode behaviors (kmeans init, EMA codebook updates,
    # code expiry / replacement, quantizer-depth dropout) and the
    # ShapeGainCodebook path are stateful / data-dependent host logic and are
    # not part of this inference kernel.
    print("KERNEL_OK")
</pallas_src>

<mosaic_0001>
module attributes {stable_mosaic.version = 11 : i64} {
  func.func @kernel(%arg0: i32, %arg1: i32, %arg2: memref<1x32x16xf32, #tpu.memory_space<vmem>>, %arg3: memref<4x128x32xf32, #tpu.memory_space<vmem>>, %arg4: memref<4x32x128xf32, #tpu.memory_space<vmem>>, %arg5: memref<4x1x128xf32, #tpu.memory_space<vmem>>, %arg6: memref<1x32x16xf32, #tpu.memory_space<vmem>>, %arg7: memref<1x1x1x128xf32, #tpu.memory_space<vmem>>) attributes {dimension_semantics = [#tpu.dimension_semantics<parallel>, #tpu.dimension_semantics<parallel>], iteration_bounds = array<i64: 2, 1>, scalar_prefetch = 0 : i64, scratch_operands = 0 : i64, tpu.core_type = #tpu.core_type<tc>, window_params = [{transform_indices = @transform_0, window_bounds = array<i64: 1, 32, 16>}, {pipeline_mode = #tpu.pipeline_mode<synchronous>, transform_indices = @transform_1, window_bounds = array<i64: 4, 128, 32>}, {pipeline_mode = #tpu.pipeline_mode<synchronous>, transform_indices = @transform_2, window_bounds = array<i64: 4, 32, 128>}, {pipeline_mode = #tpu.pipeline_mode<synchronous>, transform_indices = @transform_3, window_bounds = array<i64: 4, 1, 128>}, {transform_indices = @transform_4, window_bounds = array<i64: 1, 32, 16>}, {transform_indices = @transform_5, window_bounds = array<i64: 1, 1, 1, 128>}]} {
    %c0 = arith.constant 0 : index
    %c0_0 = arith.constant 0 : index
    %c0_1 = arith.constant 0 : index
    %0 = vector.load %arg2[%c0, %c0_0, %c0_1] : memref<1x32x16xf32, #tpu.memory_space<vmem>>, vector<1x32x16xf32>
    %1 = vector.shape_cast %0 : vector<1x32x16xf32> to vector<32x16xf32>
    %2 = tpu.transpose %1, [1, 0] : vector<32x16xf32> -> vector<16x32xf32>
    %c0_2 = arith.constant 0 : index
    %c0_3 = arith.constant 0 : index
    %c0_4 = arith.constant 0 : index
    %3 = vector.load %arg4[%c0_2, %c0_3, %c0_4] : memref<4x32x128xf32, #tpu.memory_space<vmem>>, vector<1x32x128xf32>
    %4 = vector.shape_cast %3 : vector<1x32x128xf32> to vector<32x128xf32>
    %c0_5 = arith.constant 0 : index
    %c0_6 = arith.constant 0 : index
    %c0_7 = arith.constant 0 : index
    %5 = vector.load %arg3[%c0_5, %c0_6, %c0_7] : memref<4x128x32xf32, #tpu.memory_space<vmem>>, vector<1x128x32xf32>
    %6 = vector.shape_cast %5 : vector<1x128x32xf32> to vector<128x32xf32>
    %c0_8 = arith.constant 0 : index
    %c0_9 = arith.constant 0 : index
    %c0_10 = arith.constant 0 : index
    %7 = vector.load %arg5[%c0_8, %c0_9, %c0_10] : memref<4x1x128xf32, #tpu.memory_space<vmem>>, vector<1x1x128xf32>
    %8 = vector.shape_cast %7 : vector<1x1x128xf32> to vector<1x128xf32>
    %cst = arith.constant dense<0.000000e+00> : vector<16x128xf32>
    %9 = tpu.matmul %2, %4, %cst {dimension_numbers = #tpu.dot_dimension_numbers<[1], [0], [0], [1], [0, 0, 1, 1], [], []>} : vector<16x32xf32>, vector<32x128xf32>, vector<16x128xf32> -> vector<16x128xf32>
    %10 = vector.broadcast %8 : vector<1x128xf32> to vector<16x128xf32>
    %11 = arith.subf %9, %10 : vector<16x128xf32>
    %12 = tpu.reduce_index %11 {axis = 1 : i32, kind = #tpu.reduction_kind<arg_max>} : vector<16x128xf32> -> vector<16xi32>
    %13 = vector.shape_cast %12 : vector<16xi32> to vector<16x1xi32>
    %14 = tpu.iota {dimensions = array<i32: 1>} : vector<16x128xi32>
    %15 = vector.broadcast %13 : vector<16x1xi32> to vector<16x128xi32>
    %16 = arith.cmpi eq, %14, %15 : vector<16x128xi32>
    %17 = arith.extui %16 : vector<16x128xi1> to vector<16x128xi32>
    %18 = arith.sitofp %17 : vector<16x128xi32> to vector<16x128xf32>
    %cst_11 = arith.constant dense<0.000000e+00> : vector<16x32xf32>
    %19 = tpu.matmul %18, %6, %cst_11 {dimension_numbers = #tpu.dot_dimension_numbers<[1], [0], [0], [1], [0, 0, 1, 1], [], []>} : vector<16x128xf32>, vector<128x32xf32>, vector<16x32xf32> -> vector<16x32xf32>
    %20 = arith.subf %2, %19 : vector<16x32xf32>
    %c1 = arith.constant 1 : index
    %c0_12 = arith.constant 0 : index
    %c0_13 = arith.constant 0 : index
    %21 = vector.load %arg4[%c1, %c0_12, %c0_13] : memref<4x32x128xf32, #tpu.memory_space<vmem>>, vector<1x32x128xf32>
    %22 = vector.shape_cast %21 : vector<1x32x128xf32> to vector<32x128xf32>
    %c1_14 = arith.constant 1 : index
    %c0_15 = arith.constant 0 : index
    %c0_16 = arith.constant 0 : index
    %23 = vector.load %arg3[%c1_14, %c0_15, %c0_16] : memref<4x128x32xf32, #tpu.memory_space<vmem>>, vector<1x128x32xf32>
    %24 = vector.shape_cast %23 : vector<1x128x32xf32> to vector<128x32xf32>
    %c1_17 = arith.constant 1 : index
    %c0_18 = arith.constant 0 : index
    %c0_19 = arith.constant 0 : index
    %25 = vector.load %arg5[%c1_17, %c0_18, %c0_19] : memref<4x1x128xf32, #tpu.memory_space<vmem>>, vector<1x1x128xf32>
    %26 = vector.shape_cast %25 : vector<1x1x128xf32> to vector<1x128xf32>
    %cst_20 = arith.constant dense<0.000000e+00> : vector<16x128xf32>
    %27 = tpu.matmul %20, %22, %cst_20 {dimension_numbers = #tpu.dot_dimension_numbers<[1], [0], [0], [1], [0, 0, 1, 1], [], []>} : vector<16x32xf32>, vector<32x128xf32>, vector<16x128xf32> -> vector<16x128xf32>
    %28 = vector.broadcast %26 : vector<1x128xf32> to vector<16x128xf32>
    %29 = arith.subf %27, %28 : vector<16x128xf32>
    %30 = tpu.reduce_index %29 {axis = 1 : i32, kind = #tpu.reduction_kind<arg_max>} : vector<16x128xf32> -> vector<16xi32>
    %31 = vector.shape_cast %30 : vector<16xi32> to vector<16x1xi32>
    %32 = tpu.iota {dimensions = array<i32: 1>} : vector<16x128xi32>
    %33 = vector.broadcast %31 : vector<16x1xi32> to vector<16x128xi32>
    %34 = arith.cmpi eq, %32, %33 : vector<16x128xi32>
    %35 = arith.extui %34 : vector<16x128xi1> to vector<16x128xi32>
    %36 = arith.sitofp %35 : vector<16x128xi32> to vector<16x128xf32>
    %cst_21 = arith.constant dense<0.000000e+00> : vector<16x32xf32>
    %37 = tpu.matmul %36, %24, %cst_21 {dimension_numbers = #tpu.dot_dimension_numbers<[1], [0], [0], [1], [0, 0, 1, 1], [], []>} : vector<16x128xf32>, vector<128x32xf32>, vector<16x32xf32> -> vector<16x32xf32>
    %38 = arith.subf %20, %37 : vector<16x32xf32>
    %c2 = arith.constant 2 : index
    %c0_22 = arith.constant 0 : index
    %c0_23 = arith.constant 0 : index
    %39 = vector.load %arg4[%c2, %c0_22, %c0_23] : memref<4x32x128xf32, #tpu.memory_space<vmem>>, vector<1x32x128xf32>
    %40 = vector.shape_cast %39 : vector<1x32x128xf32> to vector<32x128xf32>
    %c2_24 = arith.constant 2 : index
    %c0_25 = arith.constant 0 : index
    %c0_26 = arith.constant 0 : index
    %41 = vector.load %arg3[%c2_24, %c0_25, %c0_26] : memref<4x128x32xf32, #tpu.memory_space<vmem>>, vector<1x128x32xf32>
    %42 = vector.shape_cast %41 : vector<1x128x32xf32> to vector<128x32xf32>
    %c2_27 = arith.constant 2 : index
    %c0_28 = arith.constant 0 : index
    %c0_29 = arith.constant 0 : index
    %43 = vector.load %arg5[%c2_27, %c0_28, %c0_29] : memref<4x1x128xf32, #tpu.memory_space<vmem>>, vector<1x1x128xf32>
    %44 = vector.shape_cast %43 : vector<1x1x128xf32> to vector<1x128xf32>
    %cst_30 = arith.constant dense<0.000000e+00> : vector<16x128xf32>
    %45 = tpu.matmul %38, %40, %cst_30 {dimension_numbers = #tpu.dot_dimension_numbers<[1], [0], [0], [1], [0, 0, 1, 1], [], []>} : vector<16x32xf32>, vector<32x128xf32>, vector<16x128xf32> -> vector<16x128xf32>
    %46 = vector.broadcast %44 : vector<1x128xf32> to vector<16x128xf32>
    %47 = arith.subf %45, %46 : vector<16x128xf32>
    %48 = tpu.reduce_index %47 {axis = 1 : i32, kind = #tpu.reduction_kind<arg_max>} : vector<16x128xf32> -> vector<16xi32>
    %49 = vector.shape_cast %48 : vector<16xi32> to vector<16x1xi32>
    %50 = tpu.iota {dimensions = array<i32: 1>} : vector<16x128xi32>
    %51 = vector.broadcast %49 : vector<16x1xi32> to vector<16x128xi32>
    %52 = arith.cmpi eq, %50, %51 : vector<16x128xi32>
    %53 = arith.extui %52 : vector<16x128xi1> to vector<16x128xi32>
    %54 = arith.sitofp %53 : vector<16x128xi32> to vector<16x128xf32>
    %cst_31 = arith.constant dense<0.000000e+00> : vector<16x32xf32>
    %55 = tpu.matmul %54, %42, %cst_31 {dimension_numbers = #tpu.dot_dimension_numbers<[1], [0], [0], [1], [0, 0, 1, 1], [], []>} : vector<16x128xf32>, vector<128x32xf32>, vector<16x32xf32> -> vector<16x32xf32>
    %56 = arith.subf %38, %55 : vector<16x32xf32>
    %c3 = arith.constant 3 : index
    %c0_32 = arith.constant 0 : index
    %c0_33 = arith.constant 0 : index
    %57 = vector.load %arg4[%c3, %c0_32, %c0_33] : memref<4x32x128xf32, #tpu.memory_space<vmem>>, vector<1x32x128xf32>
    %58 = vector.shape_cast %57 : vector<1x32x128xf32> to vector<32x128xf32>
    %c3_34 = arith.constant 3 : index
    %c0_35 = arith.constant 0 : index
    %c0_36 = arith.constant 0 : index
    %59 = vector.load %arg3[%c3_34, %c0_35, %c0_36] : memref<4x128x32xf32, #tpu.memory_space<vmem>>, vector<1x128x32xf32>
    %60 = vector.shape_cast %59 : vector<1x128x32xf32> to vector<128x32xf32>
    %c3_37 = arith.constant 3 : index
    %c0_38 = arith.constant 0 : index
    %c0_39 = arith.constant 0 : index
    %61 = vector.load %arg5[%c3_37, %c0_38, %c0_39] : memref<4x1x128xf32, #tpu.memory_space<vmem>>, vector<1x1x128xf32>
    %62 = vector.shape_cast %61 : vector<1x1x128xf32> to vector<1x128xf32>
    %cst_40 = arith.constant dense<0.000000e+00> : vector<16x128xf32>
    %63 = tpu.matmul %56, %58, %cst_40 {dimension_numbers = #tpu.dot_dimension_numbers<[1], [0], [0], [1], [0, 0, 1, 1], [], []>} : vector<16x32xf32>, vector<32x128xf32>, vector<16x128xf32> -> vector<16x128xf32>
    %64 = vector.broadcast %62 : vector<1x128xf32> to vector<16x128xf32>
    %65 = arith.subf %63, %64 : vector<16x128xf32>
    %66 = tpu.reduce_index %65 {axis = 1 : i32, kind = #tpu.reduction_kind<arg_max>} : vector<16x128xf32> -> vector<16xi32>
    %67 = vector.shape_cast %66 : vector<16xi32> to vector<16x1xi32>
    %68 = tpu.iota {dimensions = array<i32: 1>} : vector<16x128xi32>
    %69 = vector.broadcast %67 : vector<16x1xi32> to vector<16x128xi32>
    %70 = arith.cmpi eq, %68, %69 : vector<16x128xi32>
    %71 = arith.extui %70 : vector<16x128xi1> to vector<16x128xi32>
    %72 = arith.sitofp %71 : vector<16x128xi32> to vector<16x128xf32>
    %cst_41 = arith.constant dense<0.000000e+00> : vector<16x32xf32>
    %73 = tpu.matmul %72, %60, %cst_41 {dimension_numbers = #tpu.dot_dimension_numbers<[1], [0], [0], [1], [0, 0, 1, 1], [], []>} : vector<16x128xf32>, vector<128x32xf32>, vector<16x32xf32> -> vector<16x32xf32>
    %74 = arith.subf %56, %73 : vector<16x32xf32>
    %75 = arith.subf %2, %74 : vector<16x32xf32>
    %76 = tpu.transpose %75, [1, 0] : vector<16x32xf32> -> vector<32x16xf32>
    %c0_42 = arith.constant 0 : index
    %c0_43 = arith.constant 0 : index
    %c0_44 = arith.constant 0 : index
    %77 = vector.load %arg6[%c0_42, %c0_43, %c0_44] : memref<1x32x16xf32, #tpu.memory_space<vmem>>, vector<1x32x16xf32>
    %78 = vector.shape_cast %77 : vector<1x32x16xf32> to vector<32x16xf32>
    %79 = vector.shape_cast %76 : vector<32x16xf32> to vector<1x32x16xf32>
    tpu.vector_store %arg6[%c0_42, %c0_43, %c0_44], %79 {strides = array<i32>} : memref<1x32x16xf32, #tpu.memory_space<vmem>>, vector<1x32x16xf32>,
    %c16_i32 = arith.constant 16 : i32
    %80 = arith.muli %arg1, %c16_i32 : i32
    %81 = tpu.iota {dimensions = array<i32: 0>} : vector<16x1xi32>
    %82 = vector.broadcast %80 : i32 to vector<16x1xi32>
    %83 = arith.addi %82, %81 : vector<16x1xi32>
    %c16_i32_45 = arith.constant 16 : i32
    %84 = vector.broadcast %c16_i32_45 : i32 to vector<16x1xi32>
    %85 = arith.cmpi slt, %83, %84 : vector<16x1xi32>
    %86 = arith.extui %85 : vector<16x1xi1> to vector<16x1xi32>
    %87 = arith.sitofp %86 : vector<16x1xi32> to vector<16x1xf32>
    %88 = arith.mulf %74, %74 : vector<16x32xf32>
    %89 = vector.broadcast %87 : vector<16x1xf32> to vector<16x32xf32>
    %90 = arith.mulf %88, %89 : vector<16x32xf32>
    %91 = vector.shape_cast %90 : vector<16x32xf32> to vector<1x16x32xf32>
    %cst_46 = arith.constant dense<0.000000e+00> : vector<1xf32>
    %92 = vector.multi_reduction <add>, %91, %cst_46 [1, 2] : vector<1x16x32xf32> to vector<1xf32>
    %93 = vector.shape_cast %92 : vector<1xf32> to vector<1x1x1xf32>
    %94 = vector.extract %93[0, 0, 0] : f32 from vector<1x1x1xf32>
    %95 = vector.broadcast %94 : f32 to vector<1x128xf32>
    %c0_47 = arith.constant 0 : index
    %c0_48 = arith.constant 0 : index
    %c0_49 = arith.constant 0 : index
    %c0_50 = arith.constant 0 : index
    %96 = vector.load %arg7[%c0_47, %c0_48, %c0_49, %c0_50] : memref<1x1x1x128xf32, #tpu.memory_space<vmem>>, vector<1x1x1x128xf32>
    %97 = vector.shape_cast %96 : vector<1x1x1x128xf32> to vector<1x128xf32>
    %98 = vector.shape_cast %95 : vector<1x128xf32> to vector<1x1x1x128xf32>
    tpu.vector_store %arg7[%c0_47, %c0_48, %c0_49, %c0_50], %98 {strides = array<i32>} : memref<1x1x1x128xf32, #tpu.memory_space<vmem>>, vector<1x1x1x128xf32>,
    return
  }
  func.func @transform_0(%arg0: i32, %arg1: i32) -> (i32, i32, i32) {
    %c0_i32 = arith.constant 0 : i32
    %c0_i32_0 = arith.constant 0 : i32
    return %arg0, %c0_i32, %arg1 : i32, i32, i32
  }
  func.func @transform_1(%arg0: i32, %arg1: i32) -> (i32, i32, i32) {
    %c0_i32 = arith.constant 0 : i32
    %c0_i32_0 = arith.constant 0 : i32
    %c0_i32_1 = arith.constant 0 : i32
    %c0_i32_2 = arith.constant 0 : i32
    return %c0_i32, %c0_i32_0, %c0_i32_1 : i32, i32, i32
  }
  func.func @transform_2(%arg0: i32, %arg1: i32) -> (i32, i32, i32) {
    %c0_i32 = arith.constant 0 : i32
    %c0_i32_0 = arith.constant 0 : i32
    %c0_i32_1 = arith.constant 0 : i32
    %c0_i32_2 = arith.constant 0 : i32
    return %c0_i32, %c0_i32_0, %c0_i32_1 : i32, i32, i32
  }
  func.func @transform_3(%arg0: i32, %arg1: i32) -> (i32, i32, i32) {
    %c0_i32 = arith.constant 0 : i32
    %c0_i32_0 = arith.constant 0 : i32
    %c0_i32_1 = arith.constant 0 : i32
    %c0_i32_2 = arith.constant 0 : i32
    return %c0_i32, %c0_i32_0, %c0_i32_1 : i32, i32, i32
  }
  func.func @transform_4(%arg0: i32, %arg1: i32) -> (i32, i32, i32) {
    %c0_i32 = arith.constant 0 : i32
    %c0_i32_0 = arith.constant 0 : i32
    return %arg0, %c0_i32, %arg1 : i32, i32, i32
  }
  func.func @transform_5(%arg0: i32, %arg1: i32) -> (i32, i32, i32, i32) {
    %c0_i32 = arith.constant 0 : i32
    %c0_i32_0 = arith.constant 0 : i32
    %c0_i32_1 = arith.constant 0 : i32
    return %arg0, %arg1, %c0_i32, %c0_i32_0 : i32, i32, i32, i32
  }
}

</mosaic_0001>

<bundles_post_ra>
// kernel: tpu_custom_call.1
= control target key start
LH: loop header
LB: loop body
LE: loop exit
PB: predicated region body
PF: predicated region fallthrough
CT: control target
= control target key end

     0   :  { %11 = vsyncpa [#allocation3], 0  ;;  %s2449_s0 = inlined_call_operand.vmem [shape: f32[2,32,16], index: 0, kind: input, shape index: {}]   ;;  %s2450_s1 = inlined_call_operand.vmem [shape: f32[4,128,32], index: 1, kind: input, shape index: {}]   ;;  %s2451_s2 = inlined_call_operand.vmem [shape: f32[4,32,128], index: 2, kind: input, shape index: {}]   ;;  %s2452_s3 = inlined_call_operand.vmem [shape: f32[4,1,128], index: 3, kind: input, shape index: {}]   ;;  %s2453_s4 = inlined_call_operand.vmem [shape: f32[2,32,16], index: 4, kind: output, shape index: {0}]   ;;  %s2454_s5 = inlined_call_operand.hbm [shape: f32[2,1,1,128], index: 5, kind: output, shape index: {1}]  }
   0x1   :  { %13 = vsyncpa [#allocation3 + $0x1], 0  ;;  %s2021_s18 = smov 0   ;;  %s2023_s19 = smov 0  }
   0x2   :  { %s2025_s20 = smov 0   ;;  %s2027_s21 = smov 0  }
   0x3   :  { %s2029_s22 = smov 0   ;;  %s2031_s23 = smov 0  }
   0x4 LB: > { %s1305_s24 = sadd.s32 4294967295, %s1987_s23   ;;  %s1306_s25 = sadd.s32 4294967294, %s1987_s23   ;;  %s1987_s23 = sphi %s2031_s23, %s19_s23   ;;  %s1983_s22 = sphi %s2029_s22, %s2461_s22   ;;  %s1979_s21 = sphi %s2027_s21, %s2460_s21   ;;  %s1975_s20 = sphi %s2025_s20, %s2459_s20   ;;  %s1971_s19 = sphi %s2023_s19, %s2458_s19   ;;  %s1967_s18 = sphi %s2021_s18, %s2457_s18  }
   0x5   : > { %s31_s26 = sadd.s32 1, %s1983_s22  ;;  %s159_s27 = sadd.s32 1, %s1975_s20 }
   0x6   : > { %p33_p0 = scmp.ge.s32.totalorder %s31_s26, 2  ;;  %p169_p1 = scmp.ne.s32.totalorder %s1975_s20, %s1971_s19 }
   0x7   : > { %p170_p2 = scmp.eq.s32.totalorder %s1305_s24, 1  ;;  %p175_p3 = scmp.ne.s32.totalorder %s1971_s19, %s1967_s18 }
   0x8   : > { %s2463_s26 = smov (%p33_p0, %s31_s26), 0  ;;  %p176_p5 = scmp.eq.s32.totalorder %s1306_s25, 1 }
   0x9   : > { %p2061_p4 = por %p170_p2, %p169_p1  ;;  %s154_s29 = ssub.s32 %s1983_s22, %s2463_s26 }
   0xa   : > { %p1309_p6 = scmp.ge.s32.totalorder %s1987_s23, 1  ;;  %p157_p7 = scmp.eq.s32.totalorder %s154_s29, 0 }
   0xb   : > { %p2068_p8 = por %p176_p5, %p175_p3  ;;  %p214_p9 = scmp.lt.s32.totalorder %s1987_s23, 3 }
   0xc   : > { %s2074_s6 = scalar_select %p157_p7, %s1975_s20, %s159_s27  }
   0xd   : > { %p215_p10 = pnand %p1309_p6, %p214_p9 }
   0xe   : > { %p252_p11 = scmp.lt.s32.totalorder (!%p215_p10), %s1979_s21, 1  ;;  %v304_v0 = vld [vmem:[%s2451_s2] sm:$0xff] (!%p215_p10)  ;;  %v305_v1 = vld [vmem:[%s2451_s2 + $0x8] sm:$0xff] (!%p215_p10)  ;;  %v306_v3 = vld [vmem:[%s2451_s2 + $0x10] sm:$0xff] (!%p215_p10)  ;;  %vm325_vm0 = vcmask (!%p215_p10), 261120   ;;  %v419_v44 = vlaneseq (!%p215_p10)  ;;  %v1989_v47 = vmov (!%p215_p10), 1.0  }
   0xf   : > { %218 = sbr.rel (%p215_p10) target bundleno = 2692 (0xa84), region = 36  ;;  %v1690_v2 = vpack.c.bf16 (!%p215_p10), %v305_v1, %v304_v0  ;;  %v307_v4 = vld [vmem:[%s2451_s2 + $0x18] sm:$0xff] (!%p215_p10)  ;;  %v308_v12 = vld [vmem:[%s2450_s1] sm:$0xff] (!%p215_p10)  ;;  %v309_v13 = vld [vmem:[%s2450_s1 + $0x8] sm:$0xff] (!%p215_p10)  ;;  %vm1138_vm9 = vcmask (!%p215_p10), 130048   ;;  %s250_s14 = sand.u32 (!%p215_p10), 1, %s1971_s19  }
  0x10   : > { %v1694_v6 = vpack.c.bf16 (!%p215_p10), %v307_v4, %v306_v3  ;;  %v310_v14 = vld [vmem:[%s2450_s1 + $0x10] sm:$0xff] (!%p215_p10)  ;;  %v1698_v15 = vpack.c.bf16 (!%p215_p10), %v309_v13, %v308_v12  ;;  %v311_v16 = vld [vmem:[%s2450_s1 + $0x18] sm:$0xff] (!%p215_p10)  ;;  %v312_v18 = vld [vmem:[%s2450_s1 + $0x20] sm:$0xff] (!%p215_p10)  ;;  %v2163_v45 = vand.u32 (!%p215_p10), 127, %v419_v44  ;;  %s1405_s17 = sshll.u32 (!%p215_p10), %s1979_s21, 4  ;;  %s1183_s27 = scalar_lea.sflag (!%p215_p10), [#allocation3], %s250_s14 }
  0x11   : > { %1691 = vmatprep.subr.bf16.mxu1 (!%p215_p10), %v1690_v2  ;;  %v1702_v17 = vpack.c.bf16 (!%p215_p10), %v311_v16, %v310_v14  ;;  %v313_v19 = vld [vmem:[%s2450_s1 + $0x28] sm:$0xff] (!%p215_p10)  ;;  %v314_v21 = vld [vmem:[%s2450_s1 + $0x30] sm:$0xff] (!%p215_p10)  ;;  %v315_v22 = vld [vmem:[%s2450_s1 + $0x38] sm:$0xff] (!%p215_p10)  ;;  %s2404_s25 = scalar_lea.hbm (!%p215_p10), %s2454_s5, %s1405_s17 }
  0x12   : > { %1693 = vmatpush3.bf16.msra.mxu1 (!%p215_p10), %v1690_v2  ;;  %v1706_v20 = vpack.c.bf16 (!%p215_p10), %v313_v19, %v312_v18  ;;  %v1710_v23 = vpack.c.bf16 (!%p215_p10), %v315_v22, %v314_v21  ;;  %v316_v24 = vld [vmem:[%s2450_s1 + $0x40] sm:$0xff] (!%p215_p10)  ;;  %v317_v25 = vld [vmem:[%s2450_s1 + $0x48] sm:$0xff] (!%p215_p10)  ;;  %v318_v27 = vld [vmem:[%s2450_s1 + $0x50] sm:$0xff] (!%p215_p10) }
  0x13   : > { %1695 = vmatprep.subr.bf16.mxu1 (!%p215_p10), %v1694_v6  ;;  %v1714_v26 = vpack.c.bf16 (!%p215_p10), %v317_v25, %v316_v24  ;;  %v319_v28 = vld [vmem:[%s2450_s1 + $0x58] sm:$0xff] (!%p215_p10)  ;;  %v320_v30 = vld [vmem:[%s2450_s1 + $0x60] sm:$0xff] (!%p215_p10)  ;;  %v321_v31 = vld [vmem:[%s2450_s1 + $0x68] sm:$0xff] (!%p215_p10) }
  0x14   : > { %v1718_v29 = vpack.c.bf16 (!%p215_p10), %v319_v28, %v318_v27  ;;  %v1722_v32 = vpack.c.bf16 (!%p215_p10), %v321_v31, %v320_v30  ;;  %v1316_v33 = vld [vmem:[%s2452_s3] ss:$0 sm:$0xff] (!%p215_p10)  ;;  %v322_v38 = vld [vmem:[%s2450_s1 + $0x70] sm:$0xff] (!%p215_p10)  ;;  %v323_v39 = vld [vmem:[%s2450_s1 + $0x78] sm:$0xff] (!%p215_p10) }
  0x15   : > { %v1726_v40 = vpack.c.bf16 (!%p215_p10), %v323_v39, %v322_v38  ;;  %v1321_v41 = vld [vmem:[%s2451_s2 + $0x20] sm:$0xff] (!%p215_p10)  ;;  %v1322_v42 = vld [vmem:[%s2451_s2 + $0x28] sm:$0xff] (!%p215_p10)  ;;  %v1323_v49 = vld [vmem:[%s2451_s2 + $0x30] sm:$0xff] (!%p215_p10) }
  0x16   : > { %s2084_s11 = scalar_select %p252_p11, %s1979_s21, 1  ;;  %1697 = vmatpush3.bf16.msra.mxu1 %v1694_v6  ;;  %v1730_v43 = vpack.c.bf16 %v1322_v42, %v1321_v41  ;;  %v1324_v50 = vld [vmem:[%s2451_s2 + $0x38] sm:$0xff]  ;;  %v1325_v56 = vld [vmem:[%s2450_s1 + $0x80] sm:$0xff]  ;;  %v1326_v57 = vld [vmem:[%s2450_s1 + $0x88] sm:$0xff] }
  0x17   : > { %1699 = vmatprep.subr.bf16.mxu1 %v1698_v15  ;;  %v1734_v51 = vpack.c.bf16 %v1324_v50, %v1323_v49  ;;  %v1327_v58 = vld [vmem:[%s2450_s1 + $0x90] sm:$0xff]  ;;  %v1738_v59 = vpack.c.bf16 %v1326_v57, %v1325_v56  ;;  %v1328_v60 = vld [vmem:[%s2450_s1 + $0x98] sm:$0xff]  ;;  %v1329_v62 = vld [vmem:[%s2450_s1 + $0xa0] sm:$0xff]  ;;  %s1990_s21 = smov [#allocation2]  }
  0x18   : > { %s1408_s12 = sshll.u32 %s2084_s11, 5  ;;  %1731 = vmatprep.subr.bf16.mxu0 %v1730_v43  ;;  %v1742_v61 = vpack.c.bf16 %v1328_v60, %v1327_v58  ;;  %v1330_v63 = vld [vmem:[%s2450_s1 + $0xa8] sm:$0xff]  ;;  %v1331_v1 = vld [vmem:[%s2450_s1 + $0xb0] sm:$0xff]  ;;  %v1332_v2 = vld [vmem:[%s2450_s1 + $0xb8] sm:$0xff]  ;;  %s1913_s7 = sshll.u32 %s1990_s21, 4  ;;  %s1914_s7 = int_to_ptr.vmem [resolvable:$false] %s1913_s7 }
  0x19   : > { %s259_s15 = scalar_lea.vmem %s2449_s0, %s1408_s12  ;;  %1733 = vmatpush3.bf16.msra.mxu0 %v1730_v43  ;;  %v1746_v0 = vpack.c.bf16 %v1330_v63, %v1329_v62  ;;  %v1750_v3 = vpack.c.bf16 %v1332_v2, %v1331_v1  ;;  %v1333_v4 = vld [vmem:[%s2450_s1 + $0xc0] sm:$0xff]  ;;  %v1338_v13 = vld [vmem:[%s2450_s1 + $0xe8] sm:$0xff]  ;;  %v1340_v21 = vld [vmem:[%s2450_s1 + $0xf8] sm:$0xff]  ;;  %s267_s13 = scalar_lea.vmem %s2453_s4, %s1408_s12 }
  0x1a   : > { %v268_v5 = vld [vmem:[%s259_s15] sm:$0xff]  ;;  %v269_v7 = vld [vmem:[%s259_s15 + $0x8] sm:$0xff]  ;;  %v270_v8 = vld [vmem:[%s259_s15 + $0x10] sm:$0xff]  ;;  %1735 = vmatprep.subr.bf16.mxu0 %v1734_v51  ;;  %s1915_s8 = scalar_lea.vmem %s1914_s7, 32 }
  0x1b   : > { %272 = vxpose.xlu0.b32.start [1/4] (short) (narrow) %v268_v5, 16  ;;  %v271_v9 = vld [vmem:[%s259_s15 + $0x18] sm:$0xff]  ;;  %v1334_v5 = vld [vmem:[%s2450_s1 + $0xc8] sm:$0xff]  ;;  %v1337_v12 = vld [vmem:[%s2450_s1 + $0xe0] sm:$0xff]  ;;  %s251_s15 = scalar_lea.vmem [#allocation2], %s250_s14 }
  0x1c   : > { %v1754_v6 = vpack.c.bf16 %v1334_v5, %v1333_v4  ;;  %v1762_v14 = vpack.c.bf16 %v1338_v13, %v1337_v12  ;;  %v1350_v24 = vld [vmem:[%s2451_s2 + $0x48] sm:$0xff]  ;;  %v1351_v28 = vld [vmem:[%s2451_s2 + $0x50] sm:$0xff]  ;;  %v1356_v39 = vld [vmem:[%s2450_s1 + $0x118] sm:$0xff]  ;;  %s1199_s16 = sshll.u32 %s251_s15, 4  ;;  %s2399_s16 = int_to_ptr.vmem [resolvable:$true] %s1199_s16 }
  0x1d   : > { %1737 = vmatpush3.bf16.msra.mxu0 %v1734_v51  ;;  %v1357_v41 = vld [vmem:[%s2450_s1 + $0x120] sm:$0xff]  ;;  %v1358_v42 = vld [vmem:[%s2450_s1 + $0x128] sm:$0xff]  ;;  %v1359_v44 = vld [vmem:[%s2450_s1 + $0x130] sm:$0xff]  ;;  %s1909_s29 = scalar_lea.vmem %s2399_s16, 16  ;;  %p1916_p1 = scmp.lt.s32.totalorder %s2399_s16, %s1914_s7 }
  0x1e   : > { %1739 = vmatprep.subr.bf16.mxu0 %v1738_v59  ;;  %v1786_v43 = vpack.c.bf16 %v1358_v42, %v1357_v41  ;;  %v1361_v49 = vld [vmem:[%s2450_s1 + $0x140] sm:$0xff]  ;;  %v1362_v50 = vld [vmem:[%s2450_s1 + $0x148] sm:$0xff]  ;;  %v1367_v58 = vld [vmem:[%s2450_s1 + $0x170] sm:$0xff]  ;;  %p1910_p12 = scmp.ne.s32.totalorder %s2399_s16, %s1909_s29  ;;  %p1917_p2 = scmp.lt.s32.totalorder %s1915_s8, %s1909_s29 }
  0x1f   : > { %273 = vxpose.xlu0.b32.cont [2/4] (short) (narrow) %v269_v7, 16  ;;  %v1335_v7 = vld [vmem:[%s2450_s1 + $0xd0] sm:$0xff]  ;;  %v1794_v51 = vpack.c.bf16 %v1362_v50, %v1361_v49  ;;  %v1366_v56 = vld [vmem:[%s2450_s1 + $0x168] sm:$0xff]  ;;  %v1377_v2 = vld [vmem:[%s2451_s2 + $0x60] sm:$0xff] }
  0x20   : > { %v1395_v42 = vld [vmem:[%s2450_s1 + $0x1f0] sm:$0xff]  ;;  %p1911_p13 = pnand %p1910_p12, %p2061_p4  ;;  %p1918_p3 = por %p1917_p2, %p1916_p1 }
  0x22   : > { %p1912_p0 = pneg %p1911_p13 }
  0x23   : > { %274 = vxpose.xlu0.b32.cont [3/4] (short) (narrow) %v270_v8, 16  ;;  %v1336_v8 = vld [vmem:[%s2450_s1 + $0xd8] sm:$0xff] }
  0x24   : > { %p1919_p5 = pnand %p1918_p3, %p1912_p0 }
  0x27   : > { %275 = vxpose.xlu0.b32.end [4/4] (short) (narrow) %v271_v9, 16  ;;  %v1758_v9 = vpack.c.bf16 %v1336_v8, %v1335_v7  ;;  %v1379_v7 = vld [vmem:[%s2451_s2 + $0x70] sm:$0xff]  ;;  %v1380_v8 = vld [vmem:[%s2451_s2 + $0x78] sm:$0xff] }
  0x9b   : > { %v2098_v10 = vpop.trf.xlu0 }
  0x9c   : > { %1514 = vmatprep.mubr.msk.f32.mxu1 %vm325_vm0, %v2098_v10 }
  0x9f   : > { %v2102_v11 = vpop.trf.xlu0 }
  0xa0   : > { %1515 = vmatmul.mubr.msk.f32.vlgmr.msra.gmra.mrb[0].mxu1 %vm325_vm0, %v2102_v11 }
  0xa1   : > { %1701 = vmatpush3.bf16.msra.mxu1 %v1698_v15  ;;  %v1344_v15 = vld [vmem:[%s2452_s3 + $0x1] ss:$0 sm:$0xff] }
  0xa2   : > { %1703 = vmatprep.subr.bf16.mxu1 %v1702_v17 }
  0xa5   : > { %1705 = vmatpush3.bf16.msra.mxu1 %v1702_v17 }
  0xa6   : > { %1707 = vmatprep.subr.bf16.mxu1 %v1706_v20 }
  0xa9   : > { %1709 = vmatpush3.bf16.msra.mxu1 %v1706_v20  ;;  %v1339_v20 = vld [vmem:[%s2450_s1 + $0xf0] sm:$0xff] }
  0xaa   : > { %1711 = vmatprep.subr.bf16.mxu1 %v1710_v23  ;;  %v1766_v22 = vpack.c.bf16 %v1340_v21, %v1339_v20  ;;  %v1384_v20 = vld [vmem:[%s2450_s1 + $0x198] sm:$0xff] }
  0xad   : > { %1713 = vmatpush3.bf16.msra.mxu1 %v1710_v23  ;;  %v1349_v23 = vld [vmem:[%s2451_s2 + $0x40] sm:$0xff] }
  0xae   : > { %1715 = vmatprep.subr.bf16.mxu1 %v1714_v26  ;;  %v1770_v25 = vpack.c.bf16 %v1350_v24, %v1349_v23  ;;  %v1386_v23 = vld [vmem:[%s2450_s1 + $0x1a8] sm:$0xff] }
  0xb1   : > { %1717 = vmatpush3.bf16.msra.mxu1 %v1714_v26 }
  0xb2   : > { %1719 = vmatprep.subr.bf16.mxu1 %v1718_v29 }
  0xb5   : > { %1721 = vmatpush3.bf16.msra.mxu1 %v1718_v29  ;;  %v1352_v29 = vld [vmem:[%s2451_s2 + $0x58] sm:$0xff] }
  0xb6   : > { %1723 = vmatprep.subr.bf16.mxu1 %v1722_v32  ;;  %v1774_v30 = vpack.c.bf16 %v1352_v29, %v1351_v28  ;;  %v1389_v28 = vld [vmem:[%s2450_s1 + $0x1c0] sm:$0xff]  ;;  %v1390_v29 = vld [vmem:[%s2450_s1 + $0x1c8] sm:$0xff] }
  0xb9   : > { %1725 = vmatpush3.bf16.msra.mxu1 %v1722_v32 }
  0xba   : > { %1727 = vmatprep.subr.bf16.mxu1 %v1726_v40 }
  0xbd   : > { %1729 = vmatpush3.bf16.msra.mxu1 %v1726_v40 }
  0xbe   : > { %1771 = vmatprep.subr.bf16.mxu1 %v1770_v25 }
 0x173   : > { %v1516_v34 = vpop.f32.mrb[0].mxu1 }
 0x174   : > { %v398_v35 = vpop.f32.mrb[1].mxu1  ;;  %v414_v37 = vsub.f32 %v1516_v34, %v1316_v33 }
 0x175   : > { %v413_v36 = vsub.f32 %v398_v35, %v1316_v33  ;;  %v1353_v35 = vld [vmem:[%s2450_s1 + $0x100] sm:$0xff] }
 0x177   : > { %415 = vmax.index.xlane.f32.xlu1 %v413_v36  ;;  %v1354_v36 = vld [vmem:[%s2450_s1 + $0x108] sm:$0xff] }
 0x178   : > { %v1778_v38 = vpack.c.bf16 %v1354_v36, %v1353_v35  ;;  %v1394_v35 = vld [vmem:[%s2450_s1 + $0x1e8] sm:$0xff] }
 0x17b   : > { %417 = vmax.index.xlane.f32.xlu1 %v414_v37  ;;  %v1355_v37 = vld [vmem:[%s2450_s1 + $0x110] sm:$0xff] }
 0x17c   : > { %v1782_v40 = vpack.c.bf16 %v1356_v39, %v1355_v37  ;;  %v1400_v37 = vld [vmem:[%s2452_s3 + $0x3] ss:$0 sm:$0xff] }
 0x204   : > { %v416_v46 = vpop.xlane.xlu1 %415 }
 0x205   : > { %vm421_vm1 = vcmp.eq.s32.totalorder %v2163_v45, %v416_v46  ;;  %v1360_v46 = vld [vmem:[%s2450_s1 + $0x138] sm:$0xff] }
 0x206   : > { %1549 = vmatprep.mubr.msk.f32.mxu1 %vm421_vm1, %v1989_v47 }
 0x208   : > { %v418_v48 = vpop.xlane.xlu1 %417 }
 0x209   : > { %vm422_vm2 = vcmp.eq.s32.totalorder %v2163_v45, %v418_v48  ;;  %v1790_v48 = vpack.c.bf16 %v1360_v46, %v1359_v44 }
 0x20a   : > { %1550 = vmatmul.mubr.msk.f32.vlgmr.msra.gmra.mrb[2].mxu1 %vm422_vm2, %v1989_v47 }
 0x20b   : > { %1773 = vmatpush3.bf16.msra.mxu1 %v1770_v25  ;;  %v1387_v25 = vld [vmem:[%s2450_s1 + $0x1b0] sm:$0xff] }
 0x20c   : > { %1775 = vmatprep.subr.bf16.mxu1 %v1774_v30 }
 0x20f   : > { %1777 = vmatpush3.bf16.msra.mxu1 %v1774_v30  ;;  %v1834_v30 = vpack.c.bf16 %v1390_v29, %v1389_v28 }
 0x210   : > { %1779 = vmatprep.subr.bf16.mxu1 %v1778_v38 }
 0x2dd   : > { %v1551_v52 = vpop.f32.mrb[2].mxu1 }
 0x2de   : > { %v493_v53 = vpop.f32.mrb[3].mxu1  ;;  %v2179_v55 = vsub.f32 %v2102_v11, %v1551_v52  ;;  %v1363_v52 = vld [vmem:[%s2450_s1 + $0x150] sm:$0xff] }
 0x2df   : > { %v2176_v54 = vsub.f32 %v2098_v10, %v493_v53  ;;  %v1364_v53 = vld [vmem:[%s2450_s1 + $0x158] sm:$0xff] }
 0x2e1   : > { %1560 = vmatprep.mubr.msk.f32.mxu0 %vm325_vm0, %v2176_v54 }
 0x2e2   : > { %1561 = vmatmul.mubr.msk.f32.vlgmr.msra.gmra.mrb[0].mxu0 %vm325_vm0, %v2179_v55 }
 0x2e3   : > { %1741 = vmatpush3.bf16.msra.mxu0 %v1738_v59  ;;  %v1368_v59 = vld [vmem:[%s2450_s1 + $0x178] sm:$0xff] }
 0x2e4   : > { %1743 = vmatprep.subr.bf16.mxu0 %v1742_v61  ;;  %v1806_v60 = vpack.c.bf16 %v1368_v59, %v1367_v58 }
 0x2e7   : > { %1745 = vmatpush3.bf16.msra.mxu0 %v1742_v61  ;;  %v1372_v61 = vld [vmem:[%s2452_s3 + $0x2] ss:$0 sm:$0xff] }
 0x2e8   : > { %1747 = vmatprep.subr.bf16.mxu0 %v1746_v0 }
 0x2eb   : > { %1749 = vmatpush3.bf16.msra.mxu0 %v1746_v0 }
 0x2ec   : > { %1751 = vmatprep.subr.bf16.mxu0 %v1750_v3 }
 0x2ef   : > { %1753 = vmatpush3.bf16.msra.mxu0 %v1750_v3  ;;  %v1378_v3 = vld [vmem:[%s2451_s2 + $0x68] sm:$0xff] }
 0x2f0   : > { %1755 = vmatprep.subr.bf16.mxu0 %v1754_v6  ;;  %v1810_v4 = vpack.c.bf16 %v1378_v3, %v1377_v2 }
 0x2f3   : > { %1757 = vmatpush3.bf16.msra.mxu0 %v1754_v6 }
 0x2f4   : > { %1759 = vmatprep.subr.bf16.mxu0 %v1758_v9 }
 0x2f7   : > { %1761 = vmatpush3.bf16.msra.mxu0 %v1758_v9  ;;  %v1814_v9 = vpack.c.bf16 %v1380_v8, %v1379_v7 }
 0x2f8   : > { %1763 = vmatprep.subr.bf16.mxu0 %v1762_v14 }
 0x2fb   : > { %1765 = vmatpush3.bf16.msra.mxu0 %v1762_v14 }
 0x2fc   : > { %1767 = vmatprep.subr.bf16.mxu0 %v1766_v22 }
 0x2ff   : > { %1769 = vmatpush3.bf16.msra.mxu0 %v1766_v22  ;;  %v1385_v22 = vld [vmem:[%s2450_s1 + $0x1a0] sm:$0xff] }
 0x300   : > { %1811 = vmatprep.subr.bf16.mxu0 %v1810_v4  ;;  %v1826_v24 = vpack.c.bf16 %v1386_v23, %v1385_v22 }
 0x3b5   : > { %v1562_v16 = vpop.f32.mrb[0].mxu0 }
 0x3b6   : > { %v600_v17 = vpop.f32.mrb[1].mxu0  ;;  %v616_v19 = vsub.f32 %v1562_v16, %v1344_v15  ;;  %v1381_v16 = vld [vmem:[%s2450_s1 + $0x180] sm:$0xff] }
 0x3b7   : > { %v615_v18 = vsub.f32 %v600_v17, %v1344_v15  ;;  %v1382_v17 = vld [vmem:[%s2450_s1 + $0x188] sm:$0xff] }
 0x3b9   : > { %617 = vmax.index.xlane.f32.xlu1 %v615_v18  ;;  %v1383_v18 = vld [vmem:[%s2450_s1 + $0x190] sm:$0xff] }
 0x3ba   : > { %v1822_v21 = vpack.c.bf16 %v1384_v20, %v1383_v18 }
 0x3bd   : > { %619 = vmax.index.xlane.f32.xlu1 %v616_v19  ;;  %v1818_v19 = vpack.c.bf16 %v1382_v17, %v1381_v16 }
 0x446   : > { %v618_v26 = vpop.xlane.xlu1 %617 }
 0x447   : > { %vm621_vm3 = vcmp.eq.s32.totalorder %v2163_v45, %v618_v26  ;;  %v1388_v26 = vld [vmem:[%s2450_s1 + $0x1b8] sm:$0xff] }
 0x448   : > { %1595 = vmatprep.mubr.msk.f32.mxu0 %vm621_vm3, %v1989_v47 }
 0x44a   : > { %v620_v27 = vpop.xlane.xlu1 %619 }
 0x44b   : > { %vm622_vm4 = vcmp.eq.s32.totalorder %v2163_v45, %v620_v27  ;;  %v1830_v27 = vpack.c.bf16 %v1388_v26, %v1387_v25 }
 0x44c   : > { %1596 = vmatmul.mubr.msk.f32.vlgmr.msra.gmra.mrb[2].mxu0 %vm622_vm4, %v1989_v47 }
 0x44d   : > { %1813 = vmatpush3.bf16.msra.mxu0 %v1810_v4 }
 0x44e   : > { %1815 = vmatprep.subr.bf16.mxu0 %v1814_v9 }
 0x451   : > { %1817 = vmatpush3.bf16.msra.mxu0 %v1814_v9 }
 0x452   : > { %1819 = vmatprep.subr.bf16.mxu0 %v1818_v19 }
 0x51f   : > { %v1597_v31 = vpop.f32.mrb[2].mxu0 }
 0x520   : > { %v693_v32 = vpop.f32.mrb[3].mxu0  ;;  %v2256_v34 = vsub.f32 %v2179_v55, %v1597_v31  ;;  %v1365_v55 = vld [vmem:[%s2450_s1 + $0x160] sm:$0xff]  ;;  %v1391_v31 = vld [vmem:[%s2450_s1 + $0x1d0] sm:$0xff] }
 0x521   : > { %v2253_v33 = vsub.f32 %v2176_v54, %v693_v32  ;;  %v1798_v54 = vpack.c.bf16 %v1364_v53, %v1363_v52  ;;  %v1802_v57 = vpack.c.bf16 %v1366_v56, %v1365_v55  ;;  %v1392_v32 = vld [vmem:[%s2450_s1 + $0x1d8] sm:$0xff] }
 0x523   : > { %1606 = vmatprep.mubr.msk.f32.mxu1 %vm325_vm0, %v2253_v33 }
 0x524   : > { %1607 = vmatmul.mubr.msk.f32.vlgmr.msra.gmra.mrb[4].mxu1 %vm325_vm0, %v2256_v34 }
 0x525   : > { %1781 = vmatpush3.bf16.msra.mxu1 %v1778_v38 }
 0x526   : > { %1783 = vmatprep.subr.bf16.mxu1 %v1782_v40 }
 0x529   : > { %1785 = vmatpush3.bf16.msra.mxu1 %v1782_v40 }
 0x52a   : > { %1787 = vmatprep.subr.bf16.mxu1 %v1786_v43 }
 0x52d   : > { %1789 = vmatpush3.bf16.msra.mxu1 %v1786_v43  ;;  %v1396_v43 = vld [vmem:[%s2450_s1 + $0x1f8] sm:$0xff] }
 0x52e   : > { %1791 = vmatprep.subr.bf16.mxu1 %v1790_v48  ;;  %v1846_v44 = vpack.c.bf16 %v1396_v43, %v1395_v42 }
 0x531   : > { %1793 = vmatpush3.bf16.msra.mxu1 %v1790_v48 }
 0x532   : > { %1795 = vmatprep.subr.bf16.mxu1 %v1794_v51 }
 0x535   : > { %1797 = vmatpush3.bf16.msra.mxu1 %v1794_v51 }
 0x536   : > { %1799 = vmatprep.subr.bf16.mxu1 %v1798_v54 }
 0x539   : > { %1801 = vmatpush3.bf16.msra.mxu1 %v1798_v54 }
 0x53a   : > { %1803 = vmatprep.subr.bf16.mxu1 %v1802_v57 }
 0x53d   : > { %1805 = vmatpush3.bf16.msra.mxu1 %v1802_v57 }
 0x53e   : > { %1807 = vmatprep.subr.bf16.mxu1 %v1806_v60 }
 0x541   : > { %1809 = vmatpush3.bf16.msra.mxu1 %v1806_v60 }
 0x5f7   : > { %v1608_v62 = vpop.f32.mrb[4].mxu1 }
 0x5f8   : > { %v816_v63 = vsub.f32 %v1608_v62, %v1372_v61  ;;  %v800_v0 = vpop.f32.mrb[5].mxu1 }
 0x5f9   : > { %v815_v1 = vsub.f32 %v800_v0, %v1372_v61 }
 0x5fa   : > { %819 = vmax.index.xlane.f32.xlu1 %v816_v63 }
 0x5fb   : > { %817 = vmax.index.xlane.f32.xlu0 %v815_v1 }
 0x687   : > { %v820_v5 = vpop.xlane.xlu1 %819 }
 0x688   : > { %v818_v6 = vpop.xlane.xlu0 %817  ;;  %vm822_vm6 = vcmp.eq.s32.totalorder %v2163_v45, %v820_v5 }
 0x689   : > { %vm821_vm5 = vcmp.eq.s32.totalorder %v2163_v45, %v818_v6 }
 0x68a   : > { %1641 = vmatprep.mubr.msk.f32.mxu1 %vm821_vm5, %v1989_v47 }
 0x68b   : > { %1642 = vmatmul.mubr.msk.f32.vlgmr.msra.gmra.mrb[6].mxu1 %vm822_vm6, %v1989_v47 }
 0x75e   : > { %v1643_v12 = vpop.f32.mrb[6].mxu1 }
 0x75f   : > { %v893_v13 = vpop.f32.mrb[7].mxu1  ;;  %v903_v15 = vsub.f32 %v2256_v34, %v1643_v12  ;;  %v1393_v34 = vld [vmem:[%s2450_s1 + $0x1e0] sm:$0xff] }
 0x760   : > { %v902_v14 = vsub.f32 %v2253_v33, %v893_v13  ;;  %v1838_v33 = vpack.c.bf16 %v1392_v32, %v1391_v31  ;;  %v1842_v36 = vpack.c.bf16 %v1394_v35, %v1393_v34 }
 0x762   : > { %1652 = vmatprep.mubr.msk.f32.mxu0 %vm325_vm0, %v902_v14 }
 0x763   : > { %1653 = vmatmul.mubr.msk.f32.vlgmr.msra.gmra.mrb[4].mxu0 %vm325_vm0, %v903_v15 }
 0x764   : > { %1821 = vmatpush3.bf16.msra.mxu0 %v1818_v19 }
 0x765   : > { %1823 = vmatprep.subr.bf16.mxu0 %v1822_v21 }
 0x768   : > { %1825 = vmatpush3.bf16.msra.mxu0 %v1822_v21 }
 0x769   : > { %1827 = vmatprep.subr.bf16.mxu0 %v1826_v24 }
 0x76c   : > { %1829 = vmatpush3.bf16.msra.mxu0 %v1826_v24 }
 0x76d   : > { %1831 = vmatprep.subr.bf16.mxu0 %v1830_v27 }
 0x770   : > { %1833 = vmatpush3.bf16.msra.mxu0 %v1830_v27 }
 0x771   : > { %1835 = vmatprep.subr.bf16.mxu0 %v1834_v30 }
 0x774   : > { %1837 = vmatpush3.bf16.msra.mxu0 %v1834_v30 }
 0x775   : > { %1839 = vmatprep.subr.bf16.mxu0 %v1838_v33 }
 0x778   : > { %1841 = vmatpush3.bf16.msra.mxu0 %v1838_v33 }
 0x779   : > { %1843 = vmatprep.subr.bf16.mxu0 %v1842_v36 }
 0x77c   : > { %1845 = vmatpush3.bf16.msra.mxu0 %v1842_v36 }
 0x77d   : > { %1847 = vmatprep.subr.bf16.mxu0 %v1846_v44 }
 0x780   : > { %1849 = vmatpush3.bf16.msra.mxu0 %v1846_v44 }
 0x836   : > { %v1654_v38 = vpop.f32.mrb[4].mxu0 }
 0x837   : > { %v1000_v39 = vpop.f32.mrb[5].mxu0  ;;  %v1016_v41 = vsub.f32 %v1654_v38, %v1400_v37 }
 0x838   : > { %v1015_v40 = vsub.f32 %v1000_v39, %v1400_v37 }
 0x83a   : > { %1017 = vmax.index.xlane.f32.xlu1 %v1015_v40 }
 0x83e   : > { %1019 = vmax.index.xlane.f32.xlu1 %v1016_v41 }
 0x8c7   : > { %v1018_v46 = vpop.xlane.xlu1 %1017 }
 0x8c8   : > { %vm1021_vm7 = vcmp.eq.s32.totalorder %v2163_v45, %v1018_v46 }
 0x8c9   : > { %1687 = vmatprep.mubr.msk.f32.mxu0 %vm1021_vm7, %v1989_v47 }
 0x8cb   : > { %v1020_v48 = vpop.xlane.xlu1 %1019 }
 0x8cc   : > { %vm1022_vm8 = vcmp.eq.s32.totalorder %v2163_v45, %v1020_v48 }
 0x8cd   : > { %1688 = vmatmul.mubr.msk.f32.vlgmr.msra.gmra.mrb[6].mxu0 %vm1022_vm8, %v1989_v47 }
 0x9a0   : > { %v1689_v49 = vpop.f32.mrb[6].mxu0 }
 0x9a1   : > { %v1103_v50 = vsub.f32 %v903_v15, %v1689_v49  ;;  %v1093_v51 = vpop.f32.mrb[7].mxu0 }
 0x9a2   : > { %v1102_v52 = vsub.f32 %v902_v14, %v1093_v51 }
 0x9a3   : > { %v1157_v53 = vmul.f32 %v1103_v50, %v1103_v50  ;;  %v1105_v45 = vsub.f32 %v2102_v11, %v1103_v50 }
 0x9a4   : > { %v1156_v54 = vmul.f32 %v1102_v52, %v1102_v52  ;;  %v1104_v58 = vsub.f32 %v2098_v10, %v1102_v52 }
 0x9a5   : > { %v1161_v55 = vsel %vm325_vm0, %v1157_v53, 0.0 }
 0x9a6   : > { %v1160_v56 = vsel %vm325_vm0, %v1156_v54, 0.0 }
 0x9a7   : > { %v1162_v57 = vadd.f32 %v1161_v55, %v1160_v56 }
 0x9a9   : > { %1163 = vadd.xlane.f32.xlu1 %v1162_v57 }
 0x9dc   : > { %1106 = vxpose.xlu1.b32.start [1/2] (short) (narrow) %v1104_v58, 32 }
 0x9e0   : > { %1107 = vxpose.xlu1.b32.end [2/2] (short) (narrow) %v1105_v45, 32 }
 0xa36   : > { %v1164_v47 = vpop.xlane.xlu1 %1163 }
 0xa37   : > { %v1165_v59 = vrot.slane %v1164_v47, 4 }
 0xa39   : > { %v1166_v60 = vadd.f32 %v1165_v59, %v1164_v47 }
 0xa3b   : > { %v1167_v61 = vrot.slane %v1166_v60, 2 }
 0xa3d   : > { %v1168_v62 = vadd.f32 %v1167_v61, %v1166_v60 }
 0xa3f   : > { %v1169_v63 = vrot.slane %v1168_v62, 1 }
 0xa41   : > { %v1170_v0 = vadd.f32 %v1169_v63, %v1168_v62 }
 0xa43   : > { %1850 = vpush %v1170_v0 }
 0xa5c   : > { %v1122_v10 = vpop.trf.xlu1 }
 0xa5d   : > { %1139 = vst.msk [vmem:[%s267_s13] sm:$0xff] %vm1138_vm9, %v1122_v10 }
 0xa60   : > { %v1123_v11 = vpop.trf.xlu1 }
 0xa61   : > { %1140 = vst.msk [vmem:[%s267_s13 + $0x8] sm:$0xff] %vm1138_vm9, %v1123_v11 }
 0xa64   : > { %v1124_v1 = vpop.trf.xlu1 }
 0xa65   : > { %1141 = vst.msk [vmem:[%s267_s13 + $0x10] sm:$0xff] %vm1138_vm9, %v1124_v1 }
 0xa68   : > { %v1125_v2 = vpop.trf.xlu1 }
 0xa69   : > { %1142 = vst.msk [vmem:[%s267_s13 + $0x18] sm:$0xff] %vm1138_vm9, %v1125_v2 }
 0xa74   : > { %s1851_s11 = spop %1850 }
 0xa75   : > { %v1172_v3 = vstv %s1851_s11 }
 0xa76   : > { %1173 = vst [vmem:[%s251_s15] sm:$0x1] %v1172_v3 }
 0xa77   : > { %1922 = shalt.err (!%p1919_p5)
}
 0xa78   : > { %s1923_s9 = scalar_lea.hbm %s2404_s25, 16  ;;  %s1927_s14 = scalar_lea.hbm %s2454_s5, 32 }
 0xa79   : > { %p1924_p6 = scmp.ne.s32.totalorder %s2404_s25, %s1923_s9  ;;  %p1928_p10 = scmp.lt.u32.totalorder %s2404_s25, %s2454_s5 }
 0xa7a   : > { %p1929_p11 = scmp.lt.u32.totalorder %s1927_s14, %s1923_s9  ;;  %p1931_p13 = scmp.lt.u32.totalorder %s1923_s9, %s2404_s25 }
 0xa7b   : > { %p1925_p7 = pnand %p1924_p6, %p2061_p4 }
 0xa7c   : > { %p1930_p12 = por %p1929_p11, %p1928_p10 }
 0xa7d   : > { %p1926_p9 = pneg %p1925_p7 }
 0xa7e   : > { %p1932_p0 = por %p1931_p13, %p1930_p12 }
 0xa80   : > { %p1933_p1 = pnand %p1932_p0, %p1926_p9 }
 0xa82   : > { %1936 = shalt.err (!%p1933_p1)
}
 0xa83   : > { %1852 = dma.vmem_to_hbm [thread:$0]  (%p2061_p4), %s2399_s16, 16, %s2404_s25, %s1183_s27  }
 0xa84 PF: > { %p1858_p2 = scmp.ge.s32.totalorder %s1987_s23, 2  ;;  %s1222_s11 = sand.u32 1, %s1967_s18  }
 0xa85   : > { %s1223_s12 = scalar_lea.sflag [#allocation3], %s1222_s11 }
 0xa86   : > { %p1855_p3 = pnand %p1858_p2, %p2068_p8 }
 0xa88   : > { %1962 = dma.done.wait (!%p1855_p3), %s1223_s12, 16  }
 0xa89   : > { %1964 = vsyncadd (!%p1855_p3), %s1223_s12, 4294967280  ;;  %s19_s23 = sadd.s32 1, %s1987_s23   ;;  %s2457_s18 = smov %s1971_s19 }
 0xa8a   : > { %p16_p5 = scmp.ge.s32.totalorder %s19_s23, 4   ;;  %s2458_s19 = smov %s1975_s20 }
 0xa8b   : > { %s2459_s20 = smov %s2074_s6  ;;  %s2460_s21 = smov %s1983_s22 }
 0xa8c   : > { %s2461_s22 = smov %s2463_s26  ;;  %18 = sbr.rel (!%p16_p5) target bundleno = 4 (0x4), region = 92 }
 0xa93   :  { %1227 = vsyncpa [#allocation3], 1 }
 0xa94   :  { %1229 = vsyncpa [#allocation3 + $0x1], 1 }

</bundles_post_ra>
